<compile_context>
chip_gen: v7x
topology: tpu7x:2x2x1
jax: 0.10.0
libtpu: 0.0.40
codegen_flags: <defaults>
</compile_context>

<pallas_src>
import functools

import numpy as np
import jax
import jax.numpy as jnp
from jax.experimental import pallas as pl
from jax.experimental.pallas import tpu as pltpu

NUM_CODE_WORDS = 8
K = NUM_CODE_WORDS - 1  # 7 codeword thresholds


def _round_up(x, m):
    return ((x + m - 1) // m) * m


# --------------------------------------------------------------------------
# Kernel
# --------------------------------------------------------------------------
def quantization_kernel(p_ref, x_ref, o_ref, *, compute_dtype):
    """Elementwise soft-quantizer tile: sum of K shifted/scaled tanh's.

    p_ref: (3K,) SMEM scalars packed as [a | c | d] with d = c*b.
    x_ref, o_ref: (TM, TN) tile in VMEM.
    """
    x = x_ref[...]

    # Read the 3K scalars from SMEM once, up front (loop below is statically
    # unrolled; K == 7).
    a = [p_ref[i] for i in range(K)]
    c = [p_ref[K + i] for i in range(K)]
    d = [p_ref[2 * K + i] for i in range(K)]

    narrow = jnp.dtype(compute_dtype) != x.dtype

    def term(i):
        # Argument always computed in f32 on the VPU (4 VALU slots have slack);
        # only the tanh input is optionally narrowed (bf16 EUP path, v6e/v7x).
        arg = c[i] * x - d[i]
        if narrow:
            arg = arg.astype(compute_dtype)
        # tanh runs on the EUP (its own bundle slot); mul/add on the VPU.
        return a[i] * jnp.tanh(arg).astype(jnp.float32)

    acc = term(0)                  # init accumulator with i=0 term (no zeros+add)
    for i in range(1, K):
        acc = acc + term(i)
    o_ref[...] = acc.astype(o_ref.dtype)


# --------------------------------------------------------------------------
# Hardware query + tiling
# --------------------------------------------------------------------------
def _hw_info():
    """Physical VMEM bytes and whether the chip has a bf16 EUP path."""
    vmem_cap = 64 << 20  # conservative fallback (v7x per-TC VMEM)
    try:
        vmem_cap = int(pltpu.get_tpu_info().vmem_capacity_bytes)
    except Exception:
        pass
    bf16_eup = True
    try:
        kind = jax.devices()[0].device_kind.lower()
        # v2-v5 chips have no bf16 VPU/EUP -> keep f32 there.
        if any(tag in kind for tag in ("v2", "v3", "v4", "v5")):
            bf16_eup = False
    except Exception:
        bf16_eup = False
    return vmem_cap, bf16_eup


def _choose_tiles(N, M, itemsize, vmem_cap, n_bufs):
    """Pick (TM, TN): prefer full rows, respect the VMEM budget, >=2 blocks."""
    # Keep all live pipeline buffers within ~40% of physical VMEM.
    per_tile_budget = max(8 * 128 * itemsize, (int(0.4 * vmem_cap)) // n_bufs)

    TM = min(256, _round_up(N, 8))
    TN_full = _round_up(M, 128)
    if TM * TN_full * itemsize <= per_tile_budget:
        TN = TN_full  # full rows: fully contiguous per-tile DMAs
    else:
        TN = max(128, ((per_tile_budget // (TM * itemsize)) // 128) * 128)

    # Guarantee >= 2 grid blocks along a parallel axis when splittable, so
    # v7x's two TensorCores both get work (negligible cost on 1-TC chips).
    if pl.cdiv(N, TM) * pl.cdiv(M, TN) < 2:
        if M > 128:
            TN = max(128, _round_up(TN // 2, 128))
        elif N > 8:
            TM = max(8, _round_up(TM // 2, 8))
    return TM, TN


# --------------------------------------------------------------------------
# Wrapper
# --------------------------------------------------------------------------
def quantization_forward(x, a, b, c, *, compute_dtype=None):
    """Pallas wrapper.

    x: (N, M) float32; a, b, c: (K,) float32.
    compute_dtype: None -> hardware default (bf16 tanh on v6e/v7x, f32 on v5e).
    Pass jnp.float32 explicitly for bit-tight f32 results on any chip.
    """
    N, M = x.shape
    vmem_cap, bf16_eup = _hw_info()
    if compute_dtype is None:
        compute_dtype = jnp.bfloat16 if bf16_eup else jnp.float32

    itemsize = x.dtype.itemsize
    deep_x = jnp.dtype(compute_dtype) == jnp.dtype(jnp.bfloat16)
    x_bufs = 3 if deep_x else 2            # deeper input pipelining on bf16 path
    n_bufs = x_bufs + 2                    # + double-buffered output
    TM, TN = _choose_tiles(N, M, itemsize, vmem_cap, n_bufs)
    grid = (pl.cdiv(N, TM), pl.cdiv(M, TN))

    # Pack a, c, d = c*b into one flat SMEM array (single scalar transfer).
    # Note: folding c*b adds one extra f32 rounding vs the reference c*(x-b).
    params = jnp.concatenate([a, c, c * b]).astype(jnp.float32)

    tile_bytes = TM * TN * itemsize
    # Scoped-VMEM limit: enough for all live buffers + headroom, but never more
    # than ~75% of physical VMEM (48 MiB on v7x's 64 MiB, 96 MiB on 128 MiB).
    vmem_limit = int(min(int(0.75 * vmem_cap),
                         max(32 << 20, n_bufs * tile_bytes + (8 << 20))))

    cost = pl.CostEstimate(
        flops=4 * K * N * M,             # ~mul/sub/mul/add per term per element
        transcendentals=K * N * M,       # 7 tanh per element (the binding unit)
        bytes_accessed=2 * N * M * itemsize,
    )

    if deep_x:
        x_spec = pl.BlockSpec((TM, TN), lambda i, j: (i, j),
                              pipeline_mode=pl.Buffered(3))
    else:
        x_spec = pl.BlockSpec((TM, TN), lambda i, j: (i, j))

    kernel = functools.partial(quantization_kernel, compute_dtype=compute_dtype)

    return pl.pallas_call(
        kernel,
        out_shape=jax.ShapeDtypeStruct((N, M), x.dtype),
        grid=grid,
        in_specs=[
            pl.BlockSpec(memory_space=pltpu.MemorySpace.SMEM),  # packed scalars
            x_spec,                                             # x tile
        ],
        out_specs=pl.BlockSpec((TM, TN), lambda i, j: (i, j)),
        compiler_params=pltpu.CompilerParams(
            dimension_semantics=("parallel", "parallel"),
            vmem_limit_bytes=vmem_limit,
        ),
        cost_estimate=cost,
    )(params, x)


# --------------------------------------------------------------------------
# Parameters / reference
# --------------------------------------------------------------------------
def make_params():
    """Deterministic synthetic parameter init mirroring the module's __init__.

    `labels_train` / `train_samples` are training-data globals in the original
    code; fixed synthetic stand-ins: max(labels_train)=7.0, max(train_samples)=1.0.
    """
    max_label = 7.0
    max_sample = 1.0
    a = np.ones(K) * max_label / NUM_CODE_WORDS                 # (7,)
    b = np.linspace(-1.0, 1.0, K) * max_sample                  # (7,)
    c = 15.0 / np.mean(np.diff(b)) * np.ones(K)                 # (7,)
    return (jnp.asarray(a, jnp.float32),
            jnp.asarray(b, jnp.float32),
            jnp.asarray(c, jnp.float32))


def reference_forward(x, a, b, c):
    """Pure-JAX reference (matches the PyTorch loop + sum over dim 0)."""
    z = a[:, None, None] * jnp.tanh(c[:, None, None] * (x[None] - b[:, None, None]))
    return jnp.sum(z, axis=0)


# --------------------------------------------------------------------------
# Tests
# --------------------------------------------------------------------------
if __name__ == "__main__":
    a, b, c = make_params()
    k1, k2 = jax.random.split(jax.random.PRNGKey(0))

    # Primary test: small (batch=8, features=256) input, exact f32 path.
    # Tile chooser splits this into 2 lane blocks so both v7x cores get work.
    x1 = jax.random.uniform(k1, (8, 256), dtype=jnp.float32, minval=-1.5, maxval=1.5)
    y1 = jax.block_until_ready(quantization_forward(x1, a, b, c,
                                                    compute_dtype=jnp.float32))
    np.testing.assert_allclose(np.asarray(y1),
                               np.asarray(reference_forward(x1, a, b, c)),
                               rtol=1e-5, atol=1e-5)

    # Hardware-default path (bf16 tanh on v6e/v7x, f32 on v5e): looser tolerance,
    # since bf16 rounding of the tanh argument shifts transition-band outputs.
    y1_auto = jax.block_until_ready(quantization_forward(x1, a, b, c))
    np.testing.assert_allclose(np.asarray(y1_auto),
                               np.asarray(reference_forward(x1, a, b, c)),
                               rtol=2e-2, atol=2e-2)

    # Multi-tile test with ragged edges: 44 rows (partial sublane tile),
    # 640 lanes split into two blocks (384 + partial 256).
    x2 = jax.random.uniform(k2, (44, 640), dtype=jnp.float32, minval=-1.5, maxval=1.5)
    y2 = jax.block_until_ready(quantization_forward(x2, a, b, c,
                                                    compute_dtype=jnp.float32))
    np.testing.assert_allclose(np.asarray(y2),
                               np.asarray(reference_forward(x2, a, b, c)),
                               rtol=1e-5, atol=1e-5)

    print("KERNEL_OK")
</pallas_src>

<mosaic_0001>
module attributes {stable_mosaic.version = 11 : i64} {
  func.func @quantization_kernel(%arg0: i32, %arg1: i32, %arg2: memref<21xf32, #tpu.memory_space<smem>>, %arg3: memref<8x128xf32, #tpu.memory_space<vmem>>, %arg4: memref<8x128xf32, #tpu.memory_space<vmem>>) attributes {dimension_semantics = [#tpu.dimension_semantics<parallel>, #tpu.dimension_semantics<parallel>], iteration_bounds = array<i64: 1, 2>, scalar_prefetch = 0 : i64, scratch_operands = 0 : i64, tpu.core_type = #tpu.core_type<tc>, window_params = [{transform_indices = @transform_0, window_bounds = array<i64: 21>}, {transform_indices = @transform_1, window_bounds = array<i64: 8, 128>}, {transform_indices = @transform_2, window_bounds = array<i64: 8, 128>}]} {
    %c0 = arith.constant 0 : index
    %c0_0 = arith.constant 0 : index
    %0 = vector.load %arg3[%c0, %c0_0] : memref<8x128xf32, #tpu.memory_space<vmem>>, vector<8x128xf32>
    %c0_1 = arith.constant 0 : index
    %1 = memref.load %arg2[%c0_1] : memref<21xf32, #tpu.memory_space<smem>>
    %c1 = arith.constant 1 : index
    %2 = memref.load %arg2[%c1] : memref<21xf32, #tpu.memory_space<smem>>
    %c2 = arith.constant 2 : index
    %3 = memref.load %arg2[%c2] : memref<21xf32, #tpu.memory_space<smem>>
    %c3 = arith.constant 3 : index
    %4 = memref.load %arg2[%c3] : memref<21xf32, #tpu.memory_space<smem>>
    %c4 = arith.constant 4 : index
    %5 = memref.load %arg2[%c4] : memref<21xf32, #tpu.memory_space<smem>>
    %c5 = arith.constant 5 : index
    %6 = memref.load %arg2[%c5] : memref<21xf32, #tpu.memory_space<smem>>
    %c6 = arith.constant 6 : index
    %7 = memref.load %arg2[%c6] : memref<21xf32, #tpu.memory_space<smem>>
    %c7 = arith.constant 7 : index
    %8 = memref.load %arg2[%c7] : memref<21xf32, #tpu.memory_space<smem>>
    %c8 = arith.constant 8 : index
    %9 = memref.load %arg2[%c8] : memref<21xf32, #tpu.memory_space<smem>>
    %c9 = arith.constant 9 : index
    %10 = memref.load %arg2[%c9] : memref<21xf32, #tpu.memory_space<smem>>
    %c10 = arith.constant 10 : index
    %11 = memref.load %arg2[%c10] : memref<21xf32, #tpu.memory_space<smem>>
    %c11 = arith.constant 11 : index
    %12 = memref.load %arg2[%c11] : memref<21xf32, #tpu.memory_space<smem>>
    %c12 = arith.constant 12 : index
    %13 = memref.load %arg2[%c12] : memref<21xf32, #tpu.memory_space<smem>>
    %c13 = arith.constant 13 : index
    %14 = memref.load %arg2[%c13] : memref<21xf32, #tpu.memory_space<smem>>
    %c14 = arith.constant 14 : index
    %15 = memref.load %arg2[%c14] : memref<21xf32, #tpu.memory_space<smem>>
    %c15 = arith.constant 15 : index
    %16 = memref.load %arg2[%c15] : memref<21xf32, #tpu.memory_space<smem>>
    %c16 = arith.constant 16 : index
    %17 = memref.load %arg2[%c16] : memref<21xf32, #tpu.memory_space<smem>>
    %c17 = arith.constant 17 : index
    %18 = memref.load %arg2[%c17] : memref<21xf32, #tpu.memory_space<smem>>
    %c18 = arith.constant 18 : index
    %19 = memref.load %arg2[%c18] : memref<21xf32, #tpu.memory_space<smem>>
    %c19 = arith.constant 19 : index
    %20 = memref.load %arg2[%c19] : memref<21xf32, #tpu.memory_space<smem>>
    %c20 = arith.constant 20 : index
    %21 = memref.load %arg2[%c20] : memref<21xf32, #tpu.memory_space<smem>>
    %22 = vector.broadcast %8 : f32 to vector<8x128xf32>
    %23 = arith.mulf %22, %0 : vector<8x128xf32>
    %24 = vector.broadcast %15 : f32 to vector<8x128xf32>
    %25 = arith.subf %23, %24 : vector<8x128xf32>
    %26 = math.tanh %25 : vector<8x128xf32>
    %27 = vector.broadcast %1 : f32 to vector<8x128xf32>
    %28 = arith.mulf %27, %26 : vector<8x128xf32>
    %29 = vector.broadcast %9 : f32 to vector<8x128xf32>
    %30 = arith.mulf %29, %0 : vector<8x128xf32>
    %31 = vector.broadcast %16 : f32 to vector<8x128xf32>
    %32 = arith.subf %30, %31 : vector<8x128xf32>
    %33 = math.tanh %32 : vector<8x128xf32>
    %34 = vector.broadcast %2 : f32 to vector<8x128xf32>
    %35 = arith.mulf %34, %33 : vector<8x128xf32>
    %36 = arith.addf %28, %35 : vector<8x128xf32>
    %37 = vector.broadcast %10 : f32 to vector<8x128xf32>
    %38 = arith.mulf %37, %0 : vector<8x128xf32>
    %39 = vector.broadcast %17 : f32 to vector<8x128xf32>
    %40 = arith.subf %38, %39 : vector<8x128xf32>
    %41 = math.tanh %40 : vector<8x128xf32>
    %42 = vector.broadcast %3 : f32 to vector<8x128xf32>
    %43 = arith.mulf %42, %41 : vector<8x128xf32>
    %44 = arith.addf %36, %43 : vector<8x128xf32>
    %45 = vector.broadcast %11 : f32 to vector<8x128xf32>
    %46 = arith.mulf %45, %0 : vector<8x128xf32>
    %47 = vector.broadcast %18 : f32 to vector<8x128xf32>
    %48 = arith.subf %46, %47 : vector<8x128xf32>
    %49 = math.tanh %48 : vector<8x128xf32>
    %50 = vector.broadcast %4 : f32 to vector<8x128xf32>
    %51 = arith.mulf %50, %49 : vector<8x128xf32>
    %52 = arith.addf %44, %51 : vector<8x128xf32>
    %53 = vector.broadcast %12 : f32 to vector<8x128xf32>
    %54 = arith.mulf %53, %0 : vector<8x128xf32>
    %55 = vector.broadcast %19 : f32 to vector<8x128xf32>
    %56 = arith.subf %54, %55 : vector<8x128xf32>
    %57 = math.tanh %56 : vector<8x128xf32>
    %58 = vector.broadcast %5 : f32 to vector<8x128xf32>
    %59 = arith.mulf %58, %57 : vector<8x128xf32>
    %60 = arith.addf %52, %59 : vector<8x128xf32>
    %61 = vector.broadcast %13 : f32 to vector<8x128xf32>
    %62 = arith.mulf %61, %0 : vector<8x128xf32>
    %63 = vector.broadcast %20 : f32 to vector<8x128xf32>
    %64 = arith.subf %62, %63 : vector<8x128xf32>
    %65 = math.tanh %64 : vector<8x128xf32>
    %66 = vector.broadcast %6 : f32 to vector<8x128xf32>
    %67 = arith.mulf %66, %65 : vector<8x128xf32>
    %68 = arith.addf %60, %67 : vector<8x128xf32>
    %69 = vector.broadcast %14 : f32 to vector<8x128xf32>
    %70 = arith.mulf %69, %0 : vector<8x128xf32>
    %71 = vector.broadcast %21 : f32 to vector<8x128xf32>
    %72 = arith.subf %70, %71 : vector<8x128xf32>
    %73 = math.tanh %72 : vector<8x128xf32>
    %74 = vector.broadcast %7 : f32 to vector<8x128xf32>
    %75 = arith.mulf %74, %73 : vector<8x128xf32>
    %76 = arith.addf %68, %75 : vector<8x128xf32>
    %c0_2 = arith.constant 0 : index
    %c0_3 = arith.constant 0 : index
    %77 = vector.load %arg4[%c0_2, %c0_3] : memref<8x128xf32, #tpu.memory_space<vmem>>, vector<8x128xf32>
    tpu.vector_store %arg4[%c0_2, %c0_3], %76 {strides = array<i32>} : memref<8x128xf32, #tpu.memory_space<vmem>>, vector<8x128xf32>,
    return
  }
  func.func @transform_0(%arg0: i32, %arg1: i32) -> i32 {
    %c0_i32 = arith.constant 0 : i32
    %c0_i32_0 = arith.constant 0 : i32
    return %c0_i32 : i32
  }
  func.func @transform_1(%arg0: i32, %arg1: i32) -> (i32, i32) {
    %c0_i32 = arith.constant 0 : i32
    return %arg0, %arg1 : i32, i32
  }
  func.func @transform_2(%arg0: i32, %arg1: i32) -> (i32, i32) {
    %c0_i32 = arith.constant 0 : i32
    return %arg0, %arg1 : i32, i32
  }
}

</mosaic_0001>

<bundles_post_ra>
// kernel: tpu_custom_call.1
= control target key start
LH: loop header
LB: loop body
LE: loop exit
PB: predicated region body
PF: predicated region fallthrough
CT: control target
= control target key end

     0   :  { %7 = vsyncpa [#allocation5], 0  ;;  %s884_s0 = inlined_call_operand.hbm [shape: f32[21], index: 0, kind: input, shape index: {}]   ;;  %s885_s1 = inlined_call_operand.hbm [shape: f32[8,256], index: 1, kind: input, shape index: {}]   ;;  %s886_s2 = inlined_call_operand.hbm [shape: f32[8,256], index: 2, kind: output, shape index: {}]  }
   0x1   :  { %8 = vsyncpa [#allocation3], 0 }
   0x2   :  { %10 = vsyncpa [#allocation3 + $0x1], 0 }
   0x3   :  { %11 = vsyncpa [#allocation4], 0 }
   0x4   :  { %13 = vsyncpa [#allocation4 + $0x1], 0  ;;  %s648_s9 = smov 0   ;;  %s650_s10 = smov 0  }
   0x5   :  { %s652_s11 = smov 0   ;;  %s654_s12 = smov 0  }
   0x6   :  { %s656_s13 = smov 0   ;;  %s658_s14 = smov 0  }
   0x7 LB: > { %s377_s15 = sadd.s32 4294967295, %s628_s14   ;;  %s378_s16 = sadd.s32 4294967294, %s628_s14   ;;  %s628_s14 = sphi %s658_s14, %s19_s14   ;;  %s624_s13 = sphi %s656_s13, %s912_s13   ;;  %s620_s12 = sphi %s654_s12, %s911_s12   ;;  %s616_s11 = sphi %s652_s11, %s910_s11   ;;  %s612_s10 = sphi %s650_s10, %s909_s10   ;;  %s608_s9 = sphi %s648_s9, %s908_s9  }
   0x8   : > { %p74_p0 = scmp.ne.s32.totalorder %s612_s10, %s608_s9  ;;  %p682_p1 = scmp.eq.s32.totalorder %s377_s15, 0 }
   0x9   : > { %p686_p2 = scmp.eq.s32.totalorder %s377_s15, 1  ;;  %p106_p3 = scmp.eq.s32.totalorder %s378_s16, 1 }
   0xa   : > { %s892_s17 = scalar_select %p682_p1, 1, 0 }
   0xb   : > { %p692_p4 = por %p682_p1, %p74_p0  ;;  %p379_p5 = scmp.ge.s32.totalorder %s628_s14, 1 }
   0xc   : > { %p697_p6 = por %p106_p3, %p74_p0  ;;  %p113_p7 = scmp.lt.s32.totalorder %s628_s14, 3 }
   0xd   : > { %s894_s19 = scalar_select %p692_p4, 1, 0 }
   0xe   : > { %s895_s20 = scalar_select %p697_p6, 1, 0 }
   0xf   : > { %p702_p8 = pnand %p379_p5, %p113_p7  ;;  %s28_s22 = sadd.s32 1, %s624_s13 }
  0x10   : > { %p716_p12 = scmp.ge.s32.totalorder %s28_s22, 2  ;;  %s61_s25 = sadd.s32 1, %s616_s11 }
  0x11   : > { %p420_p10 = pneg %p702_p8  ;;  %p68_p13 = scmp.ne.s32.totalorder %s616_s11, %s612_s10 }
  0x12   : > { %p69_p0 = scmp.eq.s32.totalorder %s628_s14, 0  ;;  %s499_s28 = scalar_lea.hbm %s884_s0, 16 }
  0x13   : > { %p712_p11 = pnand %p420_p10, %p682_p1  ;;  %p500_p3 = scmp.ne.s32.totalorder %s884_s0, %s499_s28 }
  0x14   : > { %p506_p9 = scmp.lt.u32.totalorder %s499_s28, %s884_s0 }
  0x15   : > { %p501_p5 = pneg %p712_p11 }
  0x17   : > { %p502_p7 = pnand %p501_p5, %p500_p3 }
  0x19   : > { %p503_p10 = pneg %p502_p7 }
  0x1b   : > { %p508_p6 = pnand %p506_p9, %p503_p10 }
  0x1d   : > { %511 = shalt.err (!%p508_p6)
}
  0x1e   : > { %s630_s5 = smov [#allocation2]   ;;  %s914_s22 = smov (%p716_p12, %s28_s22), 0 }
  0x1f   : > { %423 = dma.hbm_to_smem (!%p712_p11), %s884_s0, 16, %s630_s5, [#allocation5]  }
  0x20   : > { %p747_p6 = por %p69_p0, %p68_p13  ;;  %p756_p9 = por %p686_p2, %p68_p13 }
  0x21   : > { %s57_s16 = ssub.s32 %s624_s13, %s914_s22  ;;  %p433_p3 = scmp.lt.s32.totalorder %s628_s14, 2 }
  0x22   : > { %s900_s15 = scalar_select %p756_p9, 1, 0 }
  0x23   : > { %p59_p5 = scmp.eq.s32.totalorder %s57_s16, 0  ;;  %s135_s23 = sand.u32 1, %s616_s11  }
  0x24   : > { %s382_s24 = sshll.u32 %s135_s23, 3  ;;  %s383_s27 = sshll.u32 %s624_s13, 7 }
  0x25   : > { %s765_s26 = scalar_select %p59_p5, %s616_s11, %s61_s25  }
  0x26   : > { %s771_s30 = scalar_lea.hbm %s885_s1, %s383_s27  ;;  %s139_s18 = scalar_lea.vmem [#allocation6], %s382_s24 }
  0x27   : > { %s148_s3 = sshll.u32 %s139_s18, 4  ;;  %p777_p2 = pnand %p433_p3, %p747_p6  ;;  %s773_s3 = int_to_ptr.vmem [resolvable:$true] %s148_s3 }
  0x28   : > { %s136_s25 = scalar_lea.sflag [#allocation3], %s135_s23  ;;  %s512_s5 = scalar_lea.hbm %s771_s30, 128 }
  0x29   : > { %p513_p11 = scmp.ne.s32.totalorder %s771_s30, %s512_s5  ;;  %p514_p12 = pneg %p777_p2 }
  0x2a   : > { %s517_s16 = scalar_lea.hbm %s885_s1, 256  ;;  %p518_p7 = scmp.lt.u32.totalorder %s771_s30, %s885_s1 }
  0x2b   : > { %p515_p13 = pnand %p514_p12, %p513_p11  ;;  %p519_p10 = scmp.lt.u32.totalorder %s517_s16, %s512_s5 }
  0x2c   : > { %p521_p3 = scmp.lt.u32.totalorder %s512_s5, %s771_s30 }
  0x2d   : > { %p516_p0 = pneg %p515_p13  ;;  %p520_p6 = por %p519_p10, %p518_p7 }
  0x2f   : > { %p522_p5 = por %p521_p3, %p520_p6 }
  0x31   : > { %p523_p9 = pnand %p522_p5, %p516_p0 }
  0x33   : > { %526 = shalt.err (!%p523_p9)
}
  0x34   : > { %s527_s23 = scalar_lea.vmem %s773_s3, 128  ;;  %s631_s27 = smov [#allocation6]  }
  0x35   : > { %p528_p11 = scmp.ne.s32.totalorder %s773_s3, %s527_s23  ;;  %s532_s28 = sshll.u32 %s631_s27, 4  ;;  %s533_s28 = int_to_ptr.vmem [resolvable:$false] %s532_s28 }
  0x36   : > { %s534_s29 = scalar_lea.vmem %s533_s28, 256  ;;  %p535_p1 = scmp.lt.s32.totalorder %s773_s3, %s533_s28 }
  0x37   : > { %p530_p13 = pnand %p528_p11, %p514_p12  ;;  %p536_p7 = scmp.lt.s32.totalorder %s534_s29, %s527_s23 }
  0x39   : > { %p531_p4 = pneg %p530_p13  ;;  %p537_p10 = por %p536_p7, %p535_p1 }
  0x3b   : > { %p538_p6 = pnand %p537_p10, %p531_p4 }
  0x3d   : > { %541 = shalt.err (!%p538_p6)
}
  0x3e   : > { %427 = dma.hbm_to_vmem [thread:$0]  (!%p777_p2), %s771_s30, 128, %s773_s3, %s136_s25  }
  0x3f   : > { %157 = sbr.rel (%p702_p8) target bundleno = 129 (0x81), region = 28  ;;  %p902_p9 = scmp.ne.s32.totalorder (!%p702_p8), %s892_s17, 0 }
  0x46   : > { %595 = dma.done.wait (%p902_p9), [#allocation5], 16  }
  0x47   : > { %597 = vsyncadd (%p902_p9), [#allocation5], 4294967280  ;;  %s813_s18 = sand.u32 1, %s612_s10   ;;  %p903_p1 = scmp.ne.s32.totalorder %s894_s19, 0 }
  0x48   : > { %s891_s4 = sshll.u32 %s813_s18, 3  ;;  %s164_s5 = scalar_lea.sflag [#allocation3], %s813_s18 }
  0x49   : > { %s167_s30 = scalar_lea.vmem [#allocation6], %s891_s4 }
  0x4a   : > { %599 = dma.done.wait (%p903_p1), %s164_s5, 128  }
  0x4b   : > { %601 = vsyncadd (%p903_p1), %s164_s5, 4294967168 }
  0x4c   : > { %172 = sfence }
  0x4d   : > { %s394_s21 = sld [smem:[#allocation2 + $0x7]]  ;;  %s395_s17 = sld [smem:[#allocation2 + $0x8]]  ;;  %v189_v0 = vld [vmem:[%s167_s30] sm:$0xff] }
  0x4e   : > { %s396_s3 = sld [smem:[#allocation2 + $0x9]]  ;;  %s397_s25 = sld [smem:[#allocation2 + $0xa]] }
  0x4f   : > { %s398_s6 = sld [smem:[#allocation2 + $0xb]]  ;;  %s399_s7 = sld [smem:[#allocation2 + $0xc]] }
  0x50   : > { %s400_s16 = sld [smem:[#allocation2 + $0xd]]  ;;  %s401_s8 = sld [smem:[#allocation2 + $0xe]] }
  0x51   : > { %s402_s24 = sld [smem:[#allocation2 + $0xf]]  ;;  %s403_s23 = sld [smem:[#allocation2 + $0x10]] }
  0x52   : > { %s404_s27 = sld [smem:[#allocation2 + $0x11]]  ;;  %s405_s28 = sld [smem:[#allocation2 + $0x12]] }
  0x53   : > { %s823_s29 = sld [smem:[#allocation2 + $0x13]]  ;;  %s825_s4 = sld [smem:[#allocation2 + $0x14]]  ;;  %v211_v1 = vstv %s394_s21  ;;  %v218_v2 = vstv %s395_s17 }
  0x54   : > { %v212_v3 = vmul.f32 %v211_v1, %v189_v0  ;;  %v219_v4 = vmul.f32 %v218_v2, %v189_v0  ;;  %v226_v5 = vstv %s396_s3  ;;  %v234_v6 = vstv %s397_s25  ;;  %s190_s19 = sld [smem:[#allocation2]]  ;;  %s388_s5 = sld [smem:[#allocation2 + $0x1]] }
  0x55   : > { %v227_v7 = vmul.f32 %v226_v5, %v189_v0  ;;  %v235_v8 = vmul.f32 %v234_v6, %v189_v0  ;;  %v242_v9 = vstv %s398_s6  ;;  %v250_v10 = vstv %s399_s7  ;;  %s389_s30 = sld [smem:[#allocation2 + $0x2]]  ;;  %s390_s21 = sld [smem:[#allocation2 + $0x3]] }
  0x56   : > { %v213_v11 = vstv %s401_s8  ;;  %v243_v12 = vmul.f32 %v242_v9, %v189_v0  ;;  %v251_v13 = vmul.f32 %v250_v10, %v189_v0  ;;  %v258_v14 = vstv %s400_s16  ;;  %s391_s17 = sld [smem:[#allocation2 + $0x4]]  ;;  %s392_s3 = sld [smem:[#allocation2 + $0x5]] }
  0x57   : > { %v214_v15 = vsub.f32 %v212_v3, %v213_v11  ;;  %v220_v16 = vstv %s402_s24  ;;  %v228_v17 = vstv %s403_s23  ;;  %v259_v18 = vmul.f32 %v258_v14, %v189_v0  ;;  %s393_s25 = sld [smem:[#allocation2 + $0x6]]  ;;  %s409_s16 = sshll.u32 %s620_s12, 7 }
  0x58   : > { %v221_v19 = vsub.f32 %v219_v4, %v220_v16  ;;  %v229_v20 = vsub.f32 %v227_v7, %v228_v17  ;;  %v236_v21 = vstv %s404_s27  ;;  %v244_v22 = vstv %s405_s28  ;;  %s837_s23 = scalar_lea.hbm %s886_s2, %s409_s16  ;;  %s268_s27 = scalar_lea.sflag [#allocation4], %s813_s18 }
  0x59   : > { %485 = vtanh.f32 %v214_v15  ;;  %v237_v23 = vsub.f32 %v235_v8, %v236_v21  ;;  %v245_v24 = vsub.f32 %v243_v12, %v244_v22  ;;  %v252_v25 = vstv %s823_s29  ;;  %p905_p8 = scmp.ne.s32.totalorder %s900_s15, 0  ;;  %s632_s12 = smov [#allocation7]  }
  0x5a   : > { %487 = vtanh.f32 %v221_v19  ;;  %v253_v26 = vsub.f32 %v251_v13, %v252_v25  ;;  %v260_v27 = vstv %s825_s4  ;;  %v216_v29 = vstv %s190_s19  ;;  %s904_s4 = sshll.u32 %s813_s18, 3  ;;  %s546_s29 = sshll.u32 %s632_s12, 4  ;;  %s547_s29 = int_to_ptr.vmem [resolvable:$false] %s546_s29 }
  0x5b   : > { %489 = vtanh.f32 %v229_v20  ;;  %v261_v28 = vsub.f32 %v259_v18, %v260_v27  ;;  %v223_v30 = vstv %s388_s5  ;;  %v231_v32 = vstv %s389_s30  ;;  %s188_s6 = scalar_lea.vmem [#allocation7], %s904_s4  ;;  %s548_s19 = scalar_lea.vmem %s547_s29, 256 }
  0x5c   : > { %491 = vtanh.f32 %v237_v23  ;;  %v239_v35 = vstv %s390_s21  ;;  %v247_v40 = vstv %s391_s17  ;;  %v255_v45 = vstv %s392_s3  ;;  %s283_s7 = sshll.u32 %s188_s6, 4  ;;  %s832_s7 = int_to_ptr.vmem [resolvable:$true] %s283_s7 }
  0x5d   : > { %493 = vtanh.f32 %v245_v24  ;;  %v263_v49 = vstv %s393_s25  ;;  %s542_s28 = scalar_lea.vmem %s832_s7, 128  ;;  %p549_p0 = scmp.lt.s32.totalorder %s832_s7, %s547_s29 }
  0x5e   : > { %495 = vtanh.f32 %v253_v26  ;;  %p543_p4 = scmp.ne.s32.totalorder %s832_s7, %s542_s28  ;;  %p550_p3 = scmp.lt.s32.totalorder %s548_s19, %s542_s28 }
  0x5f   : > { %497 = vtanh.f32 %v261_v28 }
  0x60   : > { %p544_p2 = pnand %p543_p4, %p905_p8  ;;  %p551_p5 = por %p550_p3, %p549_p0 }
  0x62   : > { %p545_p12 = pneg %p544_p2 }
  0x63   : > { %v486_v31 = vpop.eup %485 }
  0x64   : > { %v488_v33 = vpop.eup %487  ;;  %v217_v34 = vmul.f32 %v486_v31, %v216_v29  ;;  %p552_p11 = pnand %p551_p5, %p545_p12 }
  0x65   : > { %v490_v36 = vpop.eup %489  ;;  %v224_v37 = vmul.f32 %v488_v33, %v223_v30 }
  0x66   : > { %v492_v38 = vpop.eup %491  ;;  %v232_v39 = vmul.f32 %v490_v36, %v231_v32 }
  0x67   : > { %v494_v41 = vpop.eup %493  ;;  %v225_v42 = vadd.f32 %v224_v37, %v217_v34  ;;  %v240_v43 = vmul.f32 %v492_v38, %v239_v35 }
  0x68   : > { %v496_v44 = vpop.eup %495  ;;  %v248_v47 = vmul.f32 %v494_v41, %v247_v40 }
  0x69   : > { %v233_v46 = vadd.f32 %v232_v39, %v225_v42  ;;  %v498_v48 = vpop.eup %497  ;;  %v256_v51 = vmul.f32 %v496_v44, %v255_v45 }
  0x6a   : > { %v264_v53 = vmul.f32 %v498_v48, %v263_v49 }
  0x6b   : > { %v241_v50 = vadd.f32 %v240_v43, %v233_v46 }
  0x6d   : > { %v249_v52 = vadd.f32 %v248_v47, %v241_v50 }
  0x6f   : > { %v257_v54 = vadd.f32 %v256_v51, %v249_v52 }
  0x71   : > { %v265_v55 = vadd.f32 %v264_v53, %v257_v54 }
  0x73   : > { %266 = vst [vmem:[%s188_s6] sm:$0xff] %v265_v55 }
  0x74   : > { %555 = shalt.err (!%p552_p11)
}
  0x75   : > { %s556_s18 = scalar_lea.hbm %s837_s23, 128  ;;  %s560_s21 = scalar_lea.hbm %s886_s2, 256 }
  0x76   : > { %p557_p13 = scmp.ne.s32.totalorder %s837_s23, %s556_s18  ;;  %p561_p6 = scmp.lt.u32.totalorder %s837_s23, %s886_s2 }
  0x77   : > { %p562_p9 = scmp.lt.u32.totalorder %s560_s21, %s556_s18  ;;  %p564_p4 = scmp.lt.u32.totalorder %s556_s18, %s837_s23 }
  0x78   : > { %p558_p7 = pnand %p557_p13, %p905_p8 }
  0x79   : > { %p563_p1 = por %p562_p9, %p561_p6 }
  0x7a   : > { %p559_p10 = pneg %p558_p7 }
  0x7b   : > { %p565_p2 = por %p564_p4, %p563_p1 }
  0x7d   : > { %p566_p12 = pnand %p565_p2, %p559_p10 }
  0x7f   : > { %569 = shalt.err (!%p566_p12)
}
  0x80   : > { %418 = dma.vmem_to_hbm [thread:$0]  (%p905_p8), %s832_s7, 128, %s837_s23, %s268_s27  }
  0x81 PF: > { %s295_s25 = sand.u32 1, %s608_s9   ;;  %p906_p0 = scmp.ne.s32.totalorder %s895_s20, 0 }
  0x82   : > { %p907_p3 = scmp.ge.s32.totalorder %s628_s14, 2  ;;  %s296_s4 = scalar_lea.sflag [#allocation4], %s295_s25 }
  0x84   : > { %p429_p5 = pnand %p907_p3, %p906_p0 }
  0x86   : > { %603 = dma.done.wait (!%p429_p5), %s296_s4, 128  }
  0x87   : > { %605 = vsyncadd (!%p429_p5), %s296_s4, 4294967168  ;;  %s19_s14 = sadd.s32 1, %s628_s14   ;;  %s908_s9 = smov %s612_s10 }
  0x88   : > { %p16_p11 = scmp.ge.s32.totalorder %s19_s14, 4   ;;  %s909_s10 = smov %s616_s11 }
  0x89   : > { %s910_s11 = smov %s765_s26  ;;  %s911_s12 = smov %s624_s13 }
  0x8a   : > { %s912_s13 = smov %s914_s22  ;;  %18 = sbr.rel (!%p16_p11) target bundleno = 7 (0x7), region = 78 }
  0x91   :  { %301 = vsyncpa [#allocation3], 1 }
  0x92   :  { %303 = vsyncpa [#allocation3 + $0x1], 1 }
  0x93   :  { %304 = vsyncpa [#allocation4], 1 }
  0x94   :  { %306 = vsyncpa [#allocation4 + $0x1], 1 }
  0x95   :  { %307 = vsyncpa [#allocation5], 1 }
  0x96   :  { %309 = vsyncpa [#allocation5 + $0x1], 1 }

</bundles_post_ra>
